<compile_context>
chip_gen: v5e
topology: v5e:2x2
jax: 0.10.0
libtpu: 0.0.40
codegen_flags: <defaults>
</compile_context>

<pallas_src>
import functools

import jax
import jax.numpy as jnp
from jax.experimental import pallas as pl
from jax.experimental.pallas import tpu as pltpu


def _round_up(x, m):
    return ((x + m - 1) // m) * m


def _asym_loss_kernel(logits_ref, targets_ref, alpha_ref, beta_ref, out_ref,
                      *, n_rows, tile_rows, has_overhang):
    x = logits_ref[...].astype(jnp.float32)   # (T, C) upcast in-register
    t = targets_ref[...]                      # (T, 1) int32 class id per sample
    a_row = alpha_ref[...]                    # (1, C) f32, resident across all tiles
    b_row = beta_ref[...]                     # (1, C) f32, resident across all tiles

    T, C = x.shape

    # One-hot mask from a small (1, C) iota broadcast against the (T, 1) targets
    # (no (T, C) int32 temporaries).
    class_ids = jax.lax.broadcasted_iota(jnp.int32, (1, C), 1)
    y_mask = class_ids == t                   # (T, C) bool, used via selects only

    # binary_cross_entropy_with_logits, reduction='none' (numerically-stable form)
    bce = (jnp.maximum(x, 0.0)
           - jnp.where(y_mask, x, 0.0)
           + jnp.log1p(jnp.exp(-jnp.abs(x))))

    # beta[target] per sample -- the only per-sample gather needed (alpha[target] at the
    # target column equals alpha[column], so no alpha gather).
    beta_t = jnp.sum(jnp.where(y_mask, b_row, 0.0), axis=-1, keepdims=True)  # (T, 1)

    # w = beta[target] everywhere, alpha[column]==alpha[target] at the target column.
    w = jnp.where(y_mask, a_row, beta_t)      # (T, C)
    loss = bce * w

    def fold(l):
        # Sublane-group fold to an (8, C) lane-dense partial block: pure VPU vreg adds
        # (no cross-lane XLU reduce in-kernel; the final tiny sum happens in plain JAX).
        return jnp.sum(l.reshape(T // 8, 8, C), axis=0)

    if not has_overhang:
        # N is a multiple of tile_rows: no padded rows anywhere, no masking work at all.
        out_ref[...] = fold(loss)
    else:
        i = pl.program_id(0)
        last = pl.num_programs(0) - 1

        @pl.when(i < last)
        def _():
            out_ref[...] = fold(loss)

        @pl.when(i == last)
        def _():
            # Only the overhang tile pays for the row mask. Mask is a select applied
            # before the reduction so garbage (possibly NaN/Inf) padded rows contribute 0.
            row_ids = i * tile_rows + jax.lax.broadcasted_iota(jnp.int32, (T, 1), 0)
            out_ref[...] = fold(jnp.where(row_ids < n_rows, loss, 0.0))


def asymmetric_loss(logits, targets, alpha, beta, reduction="mean", max_tile_rows=None):
    """logits: (N, C) float (f32 or bf16), targets: (N,) int, alpha/beta: (C,) float."""
    N, C = logits.shape

    targets_2d = targets.astype(jnp.int32).reshape(N, 1)             # (N, 1)
    alpha_2d = jnp.asarray(alpha, dtype=jnp.float32).reshape(1, C)   # (1, C)
    beta_2d = jnp.asarray(beta, dtype=jnp.float32).reshape(1, C)     # (1, C)

    # ---- Tile sizing (dtype-aware, no fixed row cap, v7x-safe) -------------------------
    # Per-row VMEM cost estimate: double-buffered logits block (itemsize-aware),
    # double-buffered lane-padded (T, 128) int32 targets block, and ~3 fused f32
    # temporaries for the elementwise chain. Keep that estimate <= ~16 MiB and the logits
    # block itself <= ~4 MiB so double-buffering stays comfortably under the explicit
    # 32 MiB VMEM limit on every generation (v7x has only 64 MiB VMEM per TensorCore).
    itemsize = jnp.dtype(logits.dtype).itemsize
    c_pad = _round_up(C, 128)
    per_row_vmem = 2 * c_pad * itemsize + 2 * 128 * 4 + 3 * c_pad * 4
    rows_vmem = (16 * 1024 * 1024) // per_row_vmem
    rows_logits = (4 * 1024 * 1024) // (c_pad * itemsize)
    cap = max_tile_rows if max_tile_rows is not None else 1 << 30
    tile_rows = max(8, (min(_round_up(N, 8), rows_vmem, rows_logits, cap) // 8) * 8)
    num_tiles = pl.cdiv(N, tile_rows)
    has_overhang = (N % tile_rows) != 0

    # TODO(synk): for C < 128 a lane-dense re-layout folding 128//C samples per row would
    # avoid ~128/C lane-padding waste (the dominant inefficiency for small C); kept the
    # natural (TILE_N, C) layout for generality.
    # TODO(synk): targets are kept as a (T, 1) sublane-major block (lane-padded in VMEM and
    # budgeted in the tile sizing above); a (1, N) lane-dense targets block + in-kernel
    # relayout would free that VMEM for larger logits tiles.

    kernel = functools.partial(_asym_loss_kernel, n_rows=N, tile_rows=tile_rows,
                               has_overhang=has_overhang)

    partials = pl.pallas_call(
        kernel,
        out_shape=jax.ShapeDtypeStruct((num_tiles * 8, C), jnp.float32),
        grid_spec=pltpu.PrefetchScalarGridSpec(
            num_scalar_prefetch=0,
            grid=(num_tiles,),
            in_specs=[
                pl.BlockSpec((tile_rows, C), lambda i: (i, 0)),   # logits row-tile
                pl.BlockSpec((tile_rows, 1), lambda i: (i, 0)),   # targets row-tile
                pl.BlockSpec((1, C), lambda i: (0, 0)),           # alpha row (resident)
                pl.BlockSpec((1, C), lambda i: (0, 0)),           # beta row (resident)
            ],
            out_specs=pl.BlockSpec((8, C), lambda i: (i, 0)),     # lane-dense partial block
        ),
        compiler_params=pltpu.CompilerParams(
            # TODO(synk): on v7x verify both TensorCores pick up row tiles; if not, switch
            # this axis to pltpu.CORE_PARALLEL (irrelevant on single-TC v5e/v6e).
            dimension_semantics=("parallel",),
            vmem_limit_bytes=32 * 1024 * 1024,
        ),
    )(logits, targets_2d, alpha_2d, beta_2d)

    total = jnp.sum(partials)
    if reduction == "mean":
        return total / jnp.float32(N * C)
    elif reduction == "sum":
        return total
    else:
        # TODO(synk): 'none' reduction (per-element (N, C) loss) is not wired through this
        # scalar-reduction kernel; only 'mean'/'sum' are implemented.
        raise NotImplementedError("only 'mean' and 'sum' reductions are implemented")


def _reference(logits, targets, alpha, beta, reduction="mean"):
    # pure-JAX reference of the PyTorch forward, for sanity checking
    C = logits.shape[1]
    x = logits.astype(jnp.float32)
    y = jax.nn.one_hot(targets, C, dtype=jnp.float32)
    bce = jnp.maximum(x, 0.0) - x * y + jnp.log1p(jnp.exp(-jnp.abs(x)))
    pos = bce * y * alpha[targets][:, None]
    neg = bce * (1.0 - y) * beta[targets][:, None]
    loss = pos + neg
    return loss.mean() if reduction == "mean" else loss.sum()


def _run_case(key, N, C, dtype=jnp.float32, reduction="mean", max_tile_rows=None):
    k1, k2, k3, k4 = jax.random.split(key, 4)
    logits = jax.random.normal(k1, (N, C), dtype=jnp.float32).astype(dtype)
    targets = jax.random.randint(k2, (N,), 0, C, dtype=jnp.int32)
    alpha = 0.5 + 0.5 * jax.random.uniform(k3, (C,), dtype=jnp.float32)
    beta = 0.1 + 0.2 * jax.random.uniform(k4, (C,), dtype=jnp.float32)

    out = asymmetric_loss(logits, targets, alpha, beta, reduction=reduction,
                          max_tile_rows=max_tile_rows)
    out = jax.block_until_ready(out)
    ref = _reference(logits, targets, alpha, beta, reduction=reduction)
    assert jnp.allclose(out, ref, rtol=1e-5, atol=1e-5), (N, C, dtype, reduction, out, ref)
    return out


if __name__ == "__main__":
    key = jax.random.PRNGKey(0)
    keys = jax.random.split(key, 4)

    # module-consistent small shape: batch of 8 samples, 16 classes
    _run_case(keys[0], N=8, C=16, reduction="mean")
    # overhang-masking path (N not a multiple of the row tile)
    _run_case(keys[1], N=37, C=128, reduction="mean")
    # multi-tile "parallel" grid + overhang tile, forced with a small tile cap
    _run_case(keys[2], N=40, C=128, reduction="sum", max_tile_rows=16)
    # bf16 logits: no wrapper upcast, in-kernel upcast
    _run_case(keys[3], N=8, C=16, dtype=jnp.bfloat16, reduction="mean")

    print("KERNEL_OK")
</pallas_src>

<mosaic_0001>
module attributes {stable_mosaic.version = 11 : i64} {
  func.func @_asym_loss_kernel(%arg0: i32, %arg1: memref<8x16xf32, #tpu.memory_space<vmem>>, %arg2: memref<8x1xi32, #tpu.memory_space<vmem>>, %arg3: memref<1x16xf32, #tpu.memory_space<vmem>>, %arg4: memref<1x16xf32, #tpu.memory_space<vmem>>, %arg5: memref<8x16xf32, #tpu.memory_space<vmem>>) attributes {dimension_semantics = [#tpu.dimension_semantics<parallel>], iteration_bounds = array<i64: 1>, scalar_prefetch = 0 : i64, scratch_operands = 0 : i64, tpu.core_type = #tpu.core_type<tc>, window_params = [{transform_indices = @transform_0, window_bounds = array<i64: 8, 16>}, {transform_indices = @transform_1, window_bounds = array<i64: 8, 1>}, {pipeline_mode = #tpu.pipeline_mode<synchronous>, transform_indices = @transform_2, window_bounds = array<i64: 1, 16>}, {pipeline_mode = #tpu.pipeline_mode<synchronous>, transform_indices = @transform_3, window_bounds = array<i64: 1, 16>}, {transform_indices = @transform_4, window_bounds = array<i64: 8, 16>}]} {
    %c0 = arith.constant 0 : index
    %c0_0 = arith.constant 0 : index
    %0 = vector.load %arg1[%c0, %c0_0] : memref<8x16xf32, #tpu.memory_space<vmem>>, vector<8x16xf32>
    %c0_1 = arith.constant 0 : index
    %c0_2 = arith.constant 0 : index
    %1 = vector.load %arg2[%c0_1, %c0_2] : memref<8x1xi32, #tpu.memory_space<vmem>>, vector<8x1xi32>
    %c0_3 = arith.constant 0 : index
    %c0_4 = arith.constant 0 : index
    %2 = vector.load %arg3[%c0_3, %c0_4] : memref<1x16xf32, #tpu.memory_space<vmem>>, vector<1x16xf32>
    %c0_5 = arith.constant 0 : index
    %c0_6 = arith.constant 0 : index
    %3 = vector.load %arg4[%c0_5, %c0_6] : memref<1x16xf32, #tpu.memory_space<vmem>>, vector<1x16xf32>
    %4 = tpu.iota {dimensions = array<i32: 1>} : vector<1x16xi32>
    %5 = vector.broadcast %4 : vector<1x16xi32> to vector<8x16xi32>
    %6 = vector.broadcast %1 : vector<8x1xi32> to vector<8x16xi32>
    %7 = arith.cmpi eq, %5, %6 : vector<8x16xi32>
    %cst = arith.constant 0.000000e+00 : f32
    %8 = vector.broadcast %cst : f32 to vector<8x16xf32>
    %9 = arith.maximumf %0, %8 : vector<8x16xf32>
    %cst_7 = arith.constant 0.000000e+00 : f32
    %10 = vector.broadcast %cst_7 : f32 to vector<8x16xf32>
    %11 = arith.select %7, %0, %10 : vector<8x16xi1>, vector<8x16xf32>
    %12 = arith.subf %9, %11 : vector<8x16xf32>
    %13 = math.absf %0 : vector<8x16xf32>
    %cst_8 = arith.constant 0.000000e+00 : f32
    %14 = vector.broadcast %cst_8 : f32 to vector<8x16xf32>
    %15 = arith.subf %14, %13 : vector<8x16xf32>
    %16 = math.exp %15 : vector<8x16xf32>
    %17 = math.log1p %16 : vector<8x16xf32>
    %18 = arith.addf %12, %17 : vector<8x16xf32>
    %cst_9 = arith.constant 0.000000e+00 : f32
    %19 = vector.shape_cast %3 : vector<1x16xf32> to vector<1x16xf32>
    %20 = vector.broadcast %19 : vector<1x16xf32> to vector<8x16xf32>
    %21 = vector.broadcast %cst_9 : f32 to vector<8x16xf32>
    %22 = arith.select %7, %20, %21 : vector<8x16xi1>, vector<8x16xf32>
    %cst_10 = arith.constant dense<0.000000e+00> : vector<8xf32>
    %23 = vector.multi_reduction <add>, %22, %cst_10 [1] : vector<8x16xf32> to vector<8xf32>
    %24 = vector.shape_cast %23 : vector<8xf32> to vector<8x1xf32>
    %25 = vector.shape_cast %2 : vector<1x16xf32> to vector<1x16xf32>
    %26 = vector.broadcast %25 : vector<1x16xf32> to vector<8x16xf32>
    %27 = vector.shape_cast %24 : vector<8x1xf32> to vector<8x1xf32>
    %28 = vector.broadcast %27 : vector<8x1xf32> to vector<8x16xf32>
    %29 = arith.select %7, %26, %28 : vector<8x16xi1>, vector<8x16xf32>
    %30 = arith.mulf %18, %29 : vector<8x16xf32>
    %31 = vector.shape_cast %30 : vector<8x16xf32> to vector<1x8x16xf32>
    %cst_11 = arith.constant dense<0.000000e+00> : vector<8x16xf32>
    %32 = vector.multi_reduction <add>, %31, %cst_11 [0] : vector<1x8x16xf32> to vector<8x16xf32>
    %c0_12 = arith.constant 0 : index
    %c0_13 = arith.constant 0 : index
    %33 = vector.load %arg5[%c0_12, %c0_13] : memref<8x16xf32, #tpu.memory_space<vmem>>, vector<8x16xf32>
    tpu.vector_store %arg5[%c0_12, %c0_13], %32 {strides = array<i32>} : memref<8x16xf32, #tpu.memory_space<vmem>>, vector<8x16xf32>,
    return
  }
  func.func @transform_0(%arg0: i32) -> (i32, i32) {
    %c0_i32 = arith.constant 0 : i32
    %c0_i32_0 = arith.constant 0 : i32
    return %arg0, %c0_i32 : i32, i32
  }
  func.func @transform_1(%arg0: i32) -> (i32, i32) {
    %c0_i32 = arith.constant 0 : i32
    %c0_i32_0 = arith.constant 0 : i32
    return %arg0, %c0_i32 : i32, i32
  }
  func.func @transform_2(%arg0: i32) -> (i32, i32) {
    %c0_i32 = arith.constant 0 : i32
    %c0_i32_0 = arith.constant 0 : i32
    %c0_i32_1 = arith.constant 0 : i32
    return %c0_i32, %c0_i32_0 : i32, i32
  }
  func.func @transform_3(%arg0: i32) -> (i32, i32) {
    %c0_i32 = arith.constant 0 : i32
    %c0_i32_0 = arith.constant 0 : i32
    %c0_i32_1 = arith.constant 0 : i32
    return %c0_i32, %c0_i32_0 : i32, i32
  }
  func.func @transform_4(%arg0: i32) -> (i32, i32) {
    %c0_i32 = arith.constant 0 : i32
    %c0_i32_0 = arith.constant 0 : i32
    return %arg0, %c0_i32 : i32, i32
  }
}

</mosaic_0001>

<bundles_post_ra>
// kernel: tpu_custom_call.1
= control target key start
LH: loop header
LB: loop body
LE: loop exit
PB: predicated region body
PF: predicated region fallthrough
CT: control target
= control target key end

     0   :  { %v111_v1 = vmov 0   ;;  %s158_s0 = inlined_call_operand.vmem [shape: f32[8,16], index: 0, kind: input, shape index: {}]   ;;  %s159_s1 = inlined_call_operand.vmem [shape: s32[8,1], index: 1, kind: input, shape index: {}]   ;;  %s160_s2 = inlined_call_operand.vmem [shape: f32[1,16], index: 2, kind: input, shape index: {}]   ;;  %s161_s3 = inlined_call_operand.vmem [shape: f32[1,16], index: 3, kind: input, shape index: {}]   ;;  %s162_s4 = inlined_call_operand.hbm [shape: f32[8,16], index: 4, kind: output, shape index: {}]  }
   0x1   :  { %v19_v0 = vld [vmem:[%s159_s1] sm:$0xff]  ;;  %78 = vset.pattern.permute.xlu0 %v111_v1 }
   0x2   :  { %9 = vsyncpa [#allocation3], 0  ;;  %25 = vperm.xlu0 %78, %v19_v0   ;;  %v22_v2 = vlaneseq  ;;  %v79_v4 = vld [vmem:[%s161_s3] ss:$0 sm:$0xff]  ;;  %vm49_vm0 = vcmask 130048   ;;  %s112_s20 = smov [#allocation2]  }
   0x3   :  { %v18_v8 = vld [vmem:[%s158_s0] sm:$0xff]  ;;  %s65_s21 = sshll.u32 %s112_s20, 4  ;;  %s67_s24 = sshll.u32 %s162_s4, 4  ;;  %s66_s21 = int_to_ptr.vmem [resolvable:$true] %s65_s21  ;;  %s68_s24 = int_to_ptr.hbm [resolvable:$true] %s67_s24 }
   0x4   :  { %v23_v3 = vand.u32 127, %v22_v2  ;;  %v31_v9 = vand.u32 2147483647, %v18_v8  ;;  %v28_v18 = vmax.f32 %v18_v8, 0.0  ;;  %v80_v23 = vld [vmem:[%s160_s2] ss:$0 sm:$0xff] }
   0x6   :  { %v32_v10 = vsub.f32 0.0, %v31_v9 }
   0x8   :  { %v33_v11 = vmul.f32 1.442695, %v32_v10 }
   0xa   :  { %81 = vpow2.f32 %v33_v11 }
  0x10   :  { %v82_v12 = vpop.eup %81 }
  0x11   :  { %v35_v13 = vadd.f32 1.0, %v82_v12  ;;  %v38_v14 = vmul.f32 -0.5, %v82_v12  ;;  %v41_v17 = vand.u32 2147483647, %v82_v12 }
  0x13   :  { %83 = vlog2.f32 %v35_v13  ;;  %v39_v15 = vadd.f32 1.0, %v38_v14  ;;  %vm42_vm2 = vcmp.lt.f32.partialorder %v41_v17, 0.0004427343 }
  0x15   :  { %v40_v21 = vmul.f32 %v82_v12, %v39_v15 }
  0x19   :  { %v84_v16 = vpop.eup %83 }
  0x1a   :  { %v37_v20 = vmul.f32 0.6931472, %v84_v16 }
  0x1c   :  { %v43_v24 = vsel %vm42_vm2, %v40_v21, %v37_v20 }
  0x74   :  { %v26_v5 = vpop.permute.xlu0 %25 }
  0x75   :  { %vm27_vm1 = vcmp.eq.s32.totalorder %v23_v3, %v26_v5 }
  0x76   :  { %v48_v6 = vsel %vm27_vm1, %v79_v4, 0.0  ;;  %v29_v19 = vsel %vm27_vm1, %v18_v8, 0.0 }
  0x77   :  { %v50_v7 = vsel %vm49_vm0, %v48_v6, 0.0  ;;  %v30_v22 = vsub.f32 %v28_v18, %v29_v19 }
  0x78   :  { %51 = vadd.xlane.f32.xlu0 %v50_v7 }
  0x79   :  { %v44_v26 = vadd.f32 %v43_v24, %v30_v22 }
  0xeb   :  { %v52_v25 = vpop.xlane.xlu0 %51 }
  0xec   :  { %v56_v27 = vsel %vm27_vm1, %v80_v23, %v52_v25 }
  0xed   :  { %v57_v28 = vmul.f32 %v56_v27, %v44_v26 }
  0xef   :  { %59 = vst.msk [vmem:[#allocation2] sm:$0xff] %vm49_vm0, %v57_v28 }
  0xf0   :  { %70 = dma.vmem_to_hbm [thread:$0]  %s66_s21, 128, %s68_s24, [#allocation3]  }
  0xf1   :  { %109 = dma.done.wait [#allocation3], 128  }
  0xf2   :  { %110 = vsyncadd [#allocation3], 4294967168 }
  0xf3   :  { %75 = vsyncpa [#allocation3], 1 }

</bundles_post_ra>
